<compile_context>
chip_gen: v6e
topology: v6e:2x2x1
jax: 0.10.0
libtpu: 0.0.40
codegen_flags: <defaults>
</compile_context>

<pallas_src>
import functools

import jax
import jax.numpy as jnp
from jax import lax
from jax.experimental import pallas as pl
from jax.experimental.pallas import tpu as pltpu

LANE = 128


def _round_up(n, m):
    return ((n + m - 1) // m) * m


# ----------------------------- Pallas kernel ------------------------------ #
def _decoder_seq_kernel(x_ref, z_ref, h_ref, c_ref,
                        w0_ref, b0_ref, w1_ref, b1_ref, wlog_ref, blog_ref,
                        prob_ref, out_ref, hn_ref, cn_ref,
                        a0_ref, a1_ref,
                        *, in_size, out_size, hidden, z_off, h0_off, h1_off):
    t = pl.program_id(0)
    H = hidden
    O = out_size
    B = z_ref.shape[0]

    @pl.when(t == 0)
    def _init():
        # Recurrent state is carried in the VMEM-resident output blocks
        # (constant index_map) -> seed them from the HBM inputs once.
        hn_ref[...] = h_ref[...]
        cn_ref[...] = c_ref[...]
        # Zero the padded activation slabs once; the padding lanes are never
        # rewritten and multiply zero weight rows.
        a0_ref[...] = jnp.zeros_like(a0_ref)
        a1_ref[...] = jnp.zeros_like(a1_ref)
        # z is constant over the sequence -> place it in its slot once.
        a0_ref[:, z_off:z_off + O] = z_ref[...]

    def bdot(a, w_ref):
        # bf16 x bf16 on the MXU, f32 accumulation.
        return jnp.dot(a.astype(jnp.bfloat16), w_ref[...],
                       preferred_element_type=jnp.float32)

    def lstm_gates(g, c_prev):
        # PyTorch gate ordering [i, f, g, o].
        # TODO(synk): for H % 128 != 0 these are intra-vreg lane slices; pad H
        # to a lane multiple in the weight layout if H scales up.
        i = jax.nn.sigmoid(g[:, 0 * H:1 * H])
        f = jax.nn.sigmoid(g[:, 1 * H:2 * H])
        gg = jnp.tanh(g[:, 2 * H:3 * H])
        o = jax.nn.sigmoid(g[:, 3 * H:4 * H])
        c_new = f * c_prev + i * gg
        h_new = o * jnp.tanh(c_new)
        return h_new, c_new

    # previous state (read before any state writes this step)
    h_prev0 = hn_ref[0]
    h_prev1 = hn_ref[1]
    c_prev0 = cn_ref[0]
    c_prev1 = cn_ref[1]

    # ---- layer 0: one wide-K MXU pass over the [x | z | h_prev0] slab ----
    a0_ref[:, 0:in_size] = x_ref[0]
    a0_ref[:, h0_off:h0_off + H] = h_prev0
    g0 = bdot(a0_ref[...], w0_ref) + b0_ref[...]
    h0, c0 = lstm_gates(g0, c_prev0)

    # ---- layer 1: one MXU pass over the [h0 | h_prev1] slab ----
    a1_ref[:, 0:H] = h0
    a1_ref[:, h1_off:h1_off + H] = h_prev1
    g1 = bdot(a1_ref[...], w1_ref) + b1_ref[...]
    h1, c1 = lstm_gates(g1, c_prev1)

    hn_ref[0] = h0
    hn_ref[1] = h1
    cn_ref[0] = c0
    cn_ref[1] = c1

    # ---- logits (1/temp already folded into wlog/blog by the wrapper) ----
    logits = bdot(h1, wlog_ref) + blog_ref[...]

    # numerically-stable softmax (exact divide; prob rows sum to 1).
    m = jnp.max(logits, axis=-1, keepdims=True)
    e = jnp.exp(logits - m)
    prob_ref[t] = e / jnp.sum(e, axis=-1, keepdims=True)

    # argmax from logits (first-max tie-break), written into the resident
    # full-sequence output block.
    col = lax.broadcasted_iota(jnp.int32, (B, O), 1)
    out_ref[t] = jnp.min(jnp.where(logits == m, col, O),
                         axis=-1, keepdims=True)


# ------------------------------- wrappers ---------------------------------- #
def _fold_temp(params, temp):
    temp = float(temp)
    if temp == 1.0:
        return params
    inv = 1.0 / temp
    p = dict(params)
    p["wlogT"] = (params["wlogT"].astype(jnp.float32) * inv
                  ).astype(params["wlogT"].dtype)
    p["blog"] = params["blog"] * inv
    return p


def _decode_seq(x_seq, z, h, c, params):
    """Core fused decode: x_seq (S, B, in); returns prob (S,B,O), out (S,B,1),
    h_new (2,B,H), c_new (2,B,H)."""
    S, B, in_size = x_seq.shape
    H = h.shape[-1]
    O = z.shape[-1]

    z_off = _round_up(in_size, LANE)
    h0_off = z_off + _round_up(O, LANE)
    K0 = h0_off + _round_up(H, LANE)
    h1_off = _round_up(H, LANE)
    K1 = h1_off + _round_up(H, LANE)
    assert params["w0T"].shape == (K0, 4 * H)
    assert params["w1T"].shape == (K1, 4 * H)

    kernel = functools.partial(
        _decoder_seq_kernel, in_size=in_size, out_size=O, hidden=H,
        z_off=z_off, h0_off=h0_off, h1_off=h1_off)

    in_specs = [
        pl.BlockSpec((1, B, in_size), lambda t: (t, 0, 0)),   # x_t (streamed)
        pl.BlockSpec((B, O), lambda t: (0, 0)),               # z (resident)
        pl.BlockSpec((2, B, H), lambda t: (0, 0, 0)),         # h0 (read once)
        pl.BlockSpec((2, B, H), lambda t: (0, 0, 0)),         # c0 (read once)
        pl.BlockSpec((K0, 4 * H), lambda t: (0, 0)),          # W0 (resident)
        pl.BlockSpec((1, 4 * H), lambda t: (0, 0)),           # b0
        pl.BlockSpec((K1, 4 * H), lambda t: (0, 0)),          # W1 (resident)
        pl.BlockSpec((1, 4 * H), lambda t: (0, 0)),           # b1
        pl.BlockSpec((H, O), lambda t: (0, 0)),               # Wlog (resident)
        pl.BlockSpec((1, O), lambda t: (0, 0)),               # blog
    ]
    out_specs = (
        pl.BlockSpec((S, B, O), lambda t: (0, 0, 0)),   # prob (resident slab)
        pl.BlockSpec((S, B, 1), lambda t: (0, 0, 0)),   # argmax (resident)
        pl.BlockSpec((2, B, H), lambda t: (0, 0, 0)),   # h_new (carried state)
        pl.BlockSpec((2, B, H), lambda t: (0, 0, 0)),   # c_new (carried state)
    )
    out_shape = (
        jax.ShapeDtypeStruct((S, B, O), jnp.float32),
        jax.ShapeDtypeStruct((S, B, 1), jnp.int32),
        jax.ShapeDtypeStruct((2, B, H), jnp.float32),
        jax.ShapeDtypeStruct((2, B, H), jnp.float32),
    )
    scratch_shapes = [
        pltpu.VMEM((B, K0), jnp.float32),   # [x | z | h_prev0] slab
        pltpu.VMEM((B, K1), jnp.float32),   # [h0 | h_prev1] slab
    ]

    prob, out, hn, cn = pl.pallas_call(
        kernel,
        out_shape=out_shape,
        grid=(S,),
        in_specs=in_specs,
        out_specs=out_specs,
        scratch_shapes=scratch_shapes,
        input_output_aliases={2: 2, 3: 3},   # h -> h_new, c -> c_new in place
        compiler_params=pltpu.CompilerParams(
            dimension_semantics=("arbitrary",),
            vmem_limit_bytes=32 * 1024 * 1024),
    )(x_seq, z, h, c,
      params["w0T"], params["b0"], params["w1T"], params["b1"],
      params["wlogT"], params["blog"])
    return prob, out, hn, cn


def decoder_forward(x, h, c, z, params, temp=1.0):
    """Mirrors Decoder.forward (single step): returns (out, prob, h, c).

    x: (B, 1, input_size), h/c: (2, B, H), z: (B, output_size).
    out: (B, 1) int32, prob: (B, 1, output_size), h/c: (2, B, H).
    `temp` must be a static Python float (folded into projection weights)."""
    B, T, _ = x.shape
    assert T == 1, "torch.cat((x, z.unsqueeze(1)), 2) implies seq length 1"
    p = _fold_temp(params, temp)
    x_seq = jnp.transpose(x, (1, 0, 2))               # (1, B, in)
    prob, out, hn, cn = _decode_seq(x_seq, z, h, c, p)
    return out[0], jnp.transpose(prob, (1, 0, 2)), hn, cn


def decoder_forward_seq(x, h, c, z, params, temp=1.0):
    """Fused multi-step decode (one pallas_call, time on the grid):
    x: (B, S, input_size); equivalent to S chained calls of decoder_forward.
    Returns out (B, S) int32, prob (B, S, O), h (2,B,H), c (2,B,H)."""
    p = _fold_temp(params, temp)
    x_seq = jnp.transpose(x, (1, 0, 2))               # (S, B, in)
    prob, out, hn, cn = _decode_seq(x_seq, z, h, c, p)
    return (jnp.transpose(out[:, :, 0]),
            jnp.transpose(prob, (1, 0, 2)), hn, cn)


# --------------------------- pure-JAX reference ----------------------------- #
def decoder_step_ref(x2d, z, h, c, params, temp=1.0):
    """Single decode step with the same padded-slot weight layout (pure JAX)."""
    H = h.shape[-1]
    I = x2d.shape[-1]
    O = z.shape[-1]
    B = x2d.shape[0]
    z_off = _round_up(I, LANE)
    h0_off = z_off + _round_up(O, LANE)
    K0 = h0_off + _round_up(H, LANE)
    h1_off = _round_up(H, LANE)
    K1 = h1_off + _round_up(H, LANE)

    def bdot(a, w):
        return jnp.dot(a.astype(jnp.bfloat16), w,
                       preferred_element_type=jnp.float32)

    def gates(g, cv):
        i = jax.nn.sigmoid(g[:, 0 * H:1 * H])
        f = jax.nn.sigmoid(g[:, 1 * H:2 * H])
        gg = jnp.tanh(g[:, 2 * H:3 * H])
        o = jax.nn.sigmoid(g[:, 3 * H:4 * H])
        cn = f * cv + i * gg
        return o * jnp.tanh(cn), cn

    a0 = jnp.zeros((B, K0), jnp.float32)
    a0 = (a0.at[:, 0:I].set(x2d)
            .at[:, z_off:z_off + O].set(z)
            .at[:, h0_off:h0_off + H].set(h[0]))
    g0 = bdot(a0, params["w0T"]) + params["b0"]
    h0, c0 = gates(g0, c[0])

    a1 = jnp.zeros((B, K1), jnp.float32)
    a1 = a1.at[:, 0:H].set(h0).at[:, h1_off:h1_off + H].set(h[1])
    g1 = bdot(a1, params["w1T"]) + params["b1"]
    h1, c1 = gates(g1, c[1])

    logits = (bdot(h1, params["wlogT"]) + params["blog"]) / temp
    prob = jax.nn.softmax(logits, axis=-1)
    out = jnp.argmax(logits, axis=-1).astype(jnp.int32)[:, None]
    return out, prob, jnp.stack([h0, h1]), jnp.stack([c0, c1])


# ------------------------------ param init --------------------------------- #
def init_params(key, input_size, hidden_size, output_size):
    """PyTorch-style uniform(-1/sqrt(H), 1/sqrt(H)) init; LSTM weights are
    pre-concatenated / zero-padded into lane-aligned K-slots and cast to bf16."""
    H, I, O = hidden_size, input_size, output_size
    k = 1.0 / jnp.sqrt(jnp.float32(H))
    keys = jax.random.split(key, 10)

    def u(kk, shape):
        return jax.random.uniform(kk, shape, jnp.float32, -k, k)

    wih0 = u(keys[0], (4 * H, I + O))
    whh0 = u(keys[1], (4 * H, H))
    bih0 = u(keys[2], (4 * H,))
    bhh0 = u(keys[3], (4 * H,))
    wih1 = u(keys[4], (4 * H, H))
    whh1 = u(keys[5], (4 * H, H))
    bih1 = u(keys[6], (4 * H,))
    bhh1 = u(keys[7], (4 * H,))
    wlog = u(keys[8], (O, H))
    blog = u(keys[9], (O,))

    z_off = _round_up(I, LANE)
    h0_off = z_off + _round_up(O, LANE)
    K0 = h0_off + _round_up(H, LANE)
    h1_off = _round_up(H, LANE)
    K1 = h1_off + _round_up(H, LANE)

    # layer-0 weight: [x-rows | z-rows | h-rows] in lane-aligned K slots.
    w0T = jnp.zeros((K0, 4 * H), jnp.float32)
    w0T = w0T.at[0:I].set(wih0[:, :I].T)
    w0T = w0T.at[z_off:z_off + O].set(wih0[:, I:].T)
    w0T = w0T.at[h0_off:h0_off + H].set(whh0.T)

    # layer-1 weight: [h0-rows | h_prev1-rows].
    w1T = jnp.zeros((K1, 4 * H), jnp.float32)
    w1T = w1T.at[0:H].set(wih1.T)
    w1T = w1T.at[h1_off:h1_off + H].set(whh1.T)

    bf16 = jnp.bfloat16
    return dict(
        w0T=w0T.astype(bf16), b0=(bih0 + bhh0)[None, :],
        w1T=w1T.astype(bf16), b1=(bih1 + bhh1)[None, :],
        wlogT=wlog.T.astype(bf16), blog=blog[None, :],
    )


# --------------------------------- main ------------------------------------ #
if __name__ == "__main__":
    B, S = 2, 8
    input_size, hidden_size, output_size, num_layers = 4, 32, 8, 2

    root = jax.random.PRNGKey(0)
    kx, kh, kc, kz, kp = jax.random.split(root, 5)
    x_seq = jax.random.normal(kx, (B, S, input_size), jnp.float32)
    h = jax.random.normal(kh, (num_layers, B, hidden_size), jnp.float32)
    c = jax.random.normal(kc, (num_layers, B, hidden_size), jnp.float32)
    z = jax.random.normal(kz, (B, output_size), jnp.float32)
    params = init_params(kp, input_size, hidden_size, output_size)

    # ---- single-step forward (exact Decoder.forward semantics) ----
    x1 = x_seq[:, :1, :]
    fwd = jax.jit(functools.partial(decoder_forward, temp=1.0))
    out1, prob1, h1n, c1n = fwd(x1, h, c, z, params)
    jax.block_until_ready((out1, prob1, h1n, c1n))

    out_r, prob_r, h_r, c_r = decoder_step_ref(x1[:, 0, :], z, h, c, params)
    assert jnp.array_equal(out1, out_r), "argmax mismatch (single step)"
    assert jnp.allclose(prob1[:, 0, :], prob_r, atol=2e-3, rtol=2e-3), \
        "softmax mismatch (single step)"
    assert jnp.allclose(h1n, h_r, atol=1e-4), "h mismatch (single step)"
    assert jnp.allclose(c1n, c_r, atol=1e-4), "c mismatch (single step)"

    # ---- fused multi-step decode (one pallas_call, time on the grid) ----
    fwd_seq = jax.jit(functools.partial(decoder_forward_seq, temp=1.0))
    out_s, prob_s, h_s, c_s = fwd_seq(x_seq, h, c, z, params)
    jax.block_until_ready((out_s, prob_s, h_s, c_s))

    hr, cr = h, c
    outs, probs = [], []
    for t in range(S):
        o_t, p_t, hr, cr = decoder_step_ref(x_seq[:, t, :], z, hr, cr, params)
        outs.append(o_t[:, 0])
        probs.append(p_t)
    out_ref_seq = jnp.stack(outs, axis=1)     # (B, S)
    prob_ref_seq = jnp.stack(probs, axis=1)   # (B, S, O)

    assert jnp.array_equal(out_s, out_ref_seq), "argmax mismatch (sequence)"
    assert jnp.allclose(prob_s, prob_ref_seq, atol=2e-3, rtol=2e-3), \
        "softmax mismatch (sequence)"
    assert jnp.allclose(h_s, hr, atol=5e-3), "h mismatch (sequence)"
    assert jnp.allclose(c_s, cr, atol=5e-3), "c mismatch (sequence)"

    print("KERNEL_OK")
</pallas_src>

<mosaic_0001>
module attributes {stable_mosaic.version = 11 : i64} {
  func.func @_decoder_seq_kernel(%arg0: i32, %arg1: memref<1x2x4xf32, #tpu.memory_space<vmem>>, %arg2: memref<2x8xf32, #tpu.memory_space<vmem>>, %arg3: memref<2x2x32xf32, #tpu.memory_space<vmem>>, %arg4: memref<2x2x32xf32, #tpu.memory_space<vmem>>, %arg5: memref<384x128xbf16, #tpu.memory_space<vmem>>, %arg6: memref<1x128xf32, #tpu.memory_space<vmem>>, %arg7: memref<256x128xbf16, #tpu.memory_space<vmem>>, %arg8: memref<1x128xf32, #tpu.memory_space<vmem>>, %arg9: memref<32x8xbf16, #tpu.memory_space<vmem>>, %arg10: memref<1x8xf32, #tpu.memory_space<vmem>>, %arg11: memref<1x2x8xf32, #tpu.memory_space<vmem>>, %arg12: memref<1x2x1xi32, #tpu.memory_space<vmem>>, %arg13: memref<2x2x32xf32, #tpu.memory_space<vmem>>, %arg14: memref<2x2x32xf32, #tpu.memory_space<vmem>>, %arg15: memref<2x384xf32, #tpu.memory_space<vmem>>, %arg16: memref<2x256xf32, #tpu.memory_space<vmem>>) attributes {dimension_semantics = [#tpu.dimension_semantics<arbitrary>], iteration_bounds = array<i64: 1>, scalar_prefetch = 0 : i64, scratch_operands = 2 : i64, tpu.core_type = #tpu.core_type<tc>, window_params = [{transform_indices = @transform_0, window_bounds = array<i64: 1, 2, 4>}, {pipeline_mode = #tpu.pipeline_mode<synchronous>, transform_indices = @transform_1, window_bounds = array<i64: 2, 8>}, {pipeline_mode = #tpu.pipeline_mode<synchronous>, transform_indices = @transform_2, window_bounds = array<i64: 2, 2, 32>}, {pipeline_mode = #tpu.pipeline_mode<synchronous>, transform_indices = @transform_3, window_bounds = array<i64: 2, 2, 32>}, {pipeline_mode = #tpu.pipeline_mode<synchronous>, transform_indices = @transform_4, window_bounds = array<i64: 384, 128>}, {pipeline_mode = #tpu.pipeline_mode<synchronous>, transform_indices = @transform_5, window_bounds = array<i64: 1, 128>}, {pipeline_mode = #tpu.pipeline_mode<synchronous>, transform_indices = @transform_6, window_bounds = array<i64: 256, 128>}, {pipeline_mode = #tpu.pipeline_mode<synchronous>, transform_indices = @transform_7, window_bounds = array<i64: 1, 128>}, {pipeline_mode = #tpu.pipeline_mode<synchronous>, transform_indices = @transform_8, window_bounds = array<i64: 32, 8>}, {pipeline_mode = #tpu.pipeline_mode<synchronous>, transform_indices = @transform_9, window_bounds = array<i64: 1, 8>}, {pipeline_mode = #tpu.pipeline_mode<synchronous>, transform_indices = @transform_10, window_bounds = array<i64: 1, 2, 8>}, {pipeline_mode = #tpu.pipeline_mode<synchronous>, transform_indices = @transform_11, window_bounds = array<i64: 1, 2, 1>}, {pipeline_mode = #tpu.pipeline_mode<synchronous>, transform_indices = @transform_12, window_bounds = array<i64: 2, 2, 32>}, {pipeline_mode = #tpu.pipeline_mode<synchronous>, transform_indices = @transform_13, window_bounds = array<i64: 2, 2, 32>}]} {
    %c0_i32 = arith.constant 0 : i32
    %0 = arith.cmpi eq, %arg0, %c0_i32 : i32
    %1 = arith.extui %0 : i1 to i32
    %c0_i32_0 = arith.constant 0 : i32
    %2 = arith.cmpi ne, %1, %c0_i32_0 : i32
    scf.if %2 {
      %c0_63 = arith.constant 0 : index
      %c0_64 = arith.constant 0 : index
      %c0_65 = arith.constant 0 : index
      %123 = vector.load %arg3[%c0_63, %c0_64, %c0_65] : memref<2x2x32xf32, #tpu.memory_space<vmem>>, vector<2x2x32xf32>
      %c0_66 = arith.constant 0 : index
      %c0_67 = arith.constant 0 : index
      %c0_68 = arith.constant 0 : index
      %124 = vector.load %arg13[%c0_66, %c0_67, %c0_68] : memref<2x2x32xf32, #tpu.memory_space<vmem>>, vector<2x2x32xf32>
      tpu.vector_store %arg13[%c0_66, %c0_67, %c0_68], %123 {strides = array<i32>} : memref<2x2x32xf32, #tpu.memory_space<vmem>>, vector<2x2x32xf32>,
      %c0_69 = arith.constant 0 : index
      %c0_70 = arith.constant 0 : index
      %c0_71 = arith.constant 0 : index
      %125 = vector.load %arg4[%c0_69, %c0_70, %c0_71] : memref<2x2x32xf32, #tpu.memory_space<vmem>>, vector<2x2x32xf32>
      %c0_72 = arith.constant 0 : index
      %c0_73 = arith.constant 0 : index
      %c0_74 = arith.constant 0 : index
      %126 = vector.load %arg14[%c0_72, %c0_73, %c0_74] : memref<2x2x32xf32, #tpu.memory_space<vmem>>, vector<2x2x32xf32>
      tpu.vector_store %arg14[%c0_72, %c0_73, %c0_74], %125 {strides = array<i32>} : memref<2x2x32xf32, #tpu.memory_space<vmem>>, vector<2x2x32xf32>,
      %cst_75 = arith.constant 0.000000e+00 : f32
      %127 = vector.broadcast %cst_75 : f32 to vector<2x384xf32>
      %c0_76 = arith.constant 0 : index
      %c0_77 = arith.constant 0 : index
      %128 = vector.load %arg15[%c0_76, %c0_77] : memref<2x384xf32, #tpu.memory_space<vmem>>, vector<2x384xf32>
      tpu.vector_store %arg15[%c0_76, %c0_77], %127 {strides = array<i32>} : memref<2x384xf32, #tpu.memory_space<vmem>>, vector<2x384xf32>,
      %cst_78 = arith.constant 0.000000e+00 : f32
      %129 = vector.broadcast %cst_78 : f32 to vector<2x256xf32>
      %c0_79 = arith.constant 0 : index
      %c0_80 = arith.constant 0 : index
      %130 = vector.load %arg16[%c0_79, %c0_80] : memref<2x256xf32, #tpu.memory_space<vmem>>, vector<2x256xf32>
      tpu.vector_store %arg16[%c0_79, %c0_80], %129 {strides = array<i32>} : memref<2x256xf32, #tpu.memory_space<vmem>>, vector<2x256xf32>,
      %c0_81 = arith.constant 0 : index
      %c0_82 = arith.constant 0 : index
      %131 = vector.load %arg2[%c0_81, %c0_82] : memref<2x8xf32, #tpu.memory_space<vmem>>, vector<2x8xf32>
      %c0_83 = arith.constant 0 : index
      %c128_84 = arith.constant 128 : index
      %132 = vector.load %arg15[%c0_83, %c128_84] : memref<2x384xf32, #tpu.memory_space<vmem>>, vector<2x8xf32>
      tpu.vector_store %arg15[%c0_83, %c128_84], %131 {strides = array<i32>} : memref<2x384xf32, #tpu.memory_space<vmem>>, vector<2x8xf32>,
    } else {
    }
    %c0 = arith.constant 0 : index
    %c0_1 = arith.constant 0 : index
    %c0_2 = arith.constant 0 : index
    %3 = vector.load %arg13[%c0, %c0_1, %c0_2] : memref<2x2x32xf32, #tpu.memory_space<vmem>>, vector<1x2x32xf32>
    %4 = vector.shape_cast %3 : vector<1x2x32xf32> to vector<2x32xf32>
    %c1 = arith.constant 1 : index
    %c0_3 = arith.constant 0 : index
    %c0_4 = arith.constant 0 : index
    %5 = vector.load %arg13[%c1, %c0_3, %c0_4] : memref<2x2x32xf32, #tpu.memory_space<vmem>>, vector<1x2x32xf32>
    %6 = vector.shape_cast %5 : vector<1x2x32xf32> to vector<2x32xf32>
    %c0_5 = arith.constant 0 : index
    %c0_6 = arith.constant 0 : index
    %c0_7 = arith.constant 0 : index
    %7 = vector.load %arg14[%c0_5, %c0_6, %c0_7] : memref<2x2x32xf32, #tpu.memory_space<vmem>>, vector<1x2x32xf32>
    %8 = vector.shape_cast %7 : vector<1x2x32xf32> to vector<2x32xf32>
    %c1_8 = arith.constant 1 : index
    %c0_9 = arith.constant 0 : index
    %c0_10 = arith.constant 0 : index
    %9 = vector.load %arg14[%c1_8, %c0_9, %c0_10] : memref<2x2x32xf32, #tpu.memory_space<vmem>>, vector<1x2x32xf32>
    %10 = vector.shape_cast %9 : vector<1x2x32xf32> to vector<2x32xf32>
    %c0_11 = arith.constant 0 : index
    %c0_12 = arith.constant 0 : index
    %c0_13 = arith.constant 0 : index
    %11 = vector.load %arg1[%c0_11, %c0_12, %c0_13] : memref<1x2x4xf32, #tpu.memory_space<vmem>>, vector<1x2x4xf32>
    %12 = vector.shape_cast %11 : vector<1x2x4xf32> to vector<2x4xf32>
    %c0_14 = arith.constant 0 : index
    %c0_15 = arith.constant 0 : index
    %13 = vector.load %arg15[%c0_14, %c0_15] : memref<2x384xf32, #tpu.memory_space<vmem>>, vector<2x4xf32>
    tpu.vector_store %arg15[%c0_14, %c0_15], %12 {strides = array<i32>} : memref<2x384xf32, #tpu.memory_space<vmem>>, vector<2x4xf32>,
    %c0_16 = arith.constant 0 : index
    %c256 = arith.constant 256 : index
    %14 = vector.load %arg15[%c0_16, %c256] : memref<2x384xf32, #tpu.memory_space<vmem>>, vector<2x32xf32>
    tpu.vector_store %arg15[%c0_16, %c256], %4 {strides = array<i32>} : memref<2x384xf32, #tpu.memory_space<vmem>>, vector<2x32xf32>,
    %c0_17 = arith.constant 0 : index
    %c0_18 = arith.constant 0 : index
    %15 = vector.load %arg15[%c0_17, %c0_18] : memref<2x384xf32, #tpu.memory_space<vmem>>, vector<2x384xf32>
    %16 = arith.truncf %15 : vector<2x384xf32> to vector<2x384xbf16>
    %c0_19 = arith.constant 0 : index
    %c0_20 = arith.constant 0 : index
    %17 = vector.load %arg5[%c0_19, %c0_20] : memref<384x128xbf16, #tpu.memory_space<vmem>>, vector<384x128xbf16>
    %cst = arith.constant dense<0.000000e+00> : vector<2x128xf32>
    %18 = tpu.matmul %16, %17, %cst {dimension_numbers = #tpu.dot_dimension_numbers<[1], [0], [0], [1], [0, 0, 1, 1], [], []>} : vector<2x384xbf16>, vector<384x128xbf16>, vector<2x128xf32> -> vector<2x128xf32>
    %c0_21 = arith.constant 0 : index
    %c0_22 = arith.constant 0 : index
    %19 = vector.load %arg6[%c0_21, %c0_22] : memref<1x128xf32, #tpu.memory_space<vmem>>, vector<1x128xf32>
    %20 = vector.broadcast %19 : vector<1x128xf32> to vector<2x128xf32>
    %21 = arith.addf %18, %20 : vector<2x128xf32>
    %22 = vector.extract_strided_slice %21 {offsets = [0, 0], sizes = [2, 32], strides = [1, 1]} : vector<2x128xf32> to vector<2x32xf32>
    %23 = arith.negf %22 : vector<2x32xf32>
    %24 = math.exp %23 : vector<2x32xf32>
    %cst_23 = arith.constant 1.000000e+00 : f32
    %25 = vector.broadcast %cst_23 : f32 to vector<2x32xf32>
    %26 = arith.addf %25, %24 : vector<2x32xf32>
    %27 = arith.divf %25, %26 : vector<2x32xf32>
    %28 = vector.extract_strided_slice %21 {offsets = [0, 32], sizes = [2, 32], strides = [1, 1]} : vector<2x128xf32> to vector<2x32xf32>
    %29 = arith.negf %28 : vector<2x32xf32>
    %30 = math.exp %29 : vector<2x32xf32>
    %cst_24 = arith.constant 1.000000e+00 : f32
    %31 = vector.broadcast %cst_24 : f32 to vector<2x32xf32>
    %32 = arith.addf %31, %30 : vector<2x32xf32>
    %33 = arith.divf %31, %32 : vector<2x32xf32>
    %34 = vector.extract_strided_slice %21 {offsets = [0, 64], sizes = [2, 32], strides = [1, 1]} : vector<2x128xf32> to vector<2x32xf32>
    %35 = math.tanh %34 : vector<2x32xf32>
    %36 = vector.extract_strided_slice %21 {offsets = [0, 96], sizes = [2, 32], strides = [1, 1]} : vector<2x128xf32> to vector<2x32xf32>
    %37 = arith.negf %36 : vector<2x32xf32>
    %38 = math.exp %37 : vector<2x32xf32>
    %cst_25 = arith.constant 1.000000e+00 : f32
    %39 = vector.broadcast %cst_25 : f32 to vector<2x32xf32>
    %40 = arith.addf %39, %38 : vector<2x32xf32>
    %41 = arith.divf %39, %40 : vector<2x32xf32>
    %42 = arith.mulf %33, %8 : vector<2x32xf32>
    %43 = arith.mulf %27, %35 : vector<2x32xf32>
    %44 = arith.addf %42, %43 : vector<2x32xf32>
    %45 = math.tanh %44 : vector<2x32xf32>
    %46 = arith.mulf %41, %45 : vector<2x32xf32>
    %c0_26 = arith.constant 0 : index
    %c0_27 = arith.constant 0 : index
    %47 = vector.load %arg16[%c0_26, %c0_27] : memref<2x256xf32, #tpu.memory_space<vmem>>, vector<2x32xf32>
    tpu.vector_store %arg16[%c0_26, %c0_27], %46 {strides = array<i32>} : memref<2x256xf32, #tpu.memory_space<vmem>>, vector<2x32xf32>,
    %c0_28 = arith.constant 0 : index
    %c128 = arith.constant 128 : index
    %48 = vector.load %arg16[%c0_28, %c128] : memref<2x256xf32, #tpu.memory_space<vmem>>, vector<2x32xf32>
    tpu.vector_store %arg16[%c0_28, %c128], %6 {strides = array<i32>} : memref<2x256xf32, #tpu.memory_space<vmem>>, vector<2x32xf32>,
    %c0_29 = arith.constant 0 : index
    %c0_30 = arith.constant 0 : index
    %49 = vector.load %arg16[%c0_29, %c0_30] : memref<2x256xf32, #tpu.memory_space<vmem>>, vector<2x256xf32>
    %50 = arith.truncf %49 : vector<2x256xf32> to vector<2x256xbf16>
    %c0_31 = arith.constant 0 : index
    %c0_32 = arith.constant 0 : index
    %51 = vector.load %arg7[%c0_31, %c0_32] : memref<256x128xbf16, #tpu.memory_space<vmem>>, vector<256x128xbf16>
    %cst_33 = arith.constant dense<0.000000e+00> : vector<2x128xf32>
    %52 = tpu.matmul %50, %51, %cst_33 {dimension_numbers = #tpu.dot_dimension_numbers<[1], [0], [0], [1], [0, 0, 1, 1], [], []>} : vector<2x256xbf16>, vector<256x128xbf16>, vector<2x128xf32> -> vector<2x128xf32>
    %c0_34 = arith.constant 0 : index
    %c0_35 = arith.constant 0 : index
    %53 = vector.load %arg8[%c0_34, %c0_35] : memref<1x128xf32, #tpu.memory_space<vmem>>, vector<1x128xf32>
    %54 = vector.broadcast %53 : vector<1x128xf32> to vector<2x128xf32>
    %55 = arith.addf %52, %54 : vector<2x128xf32>
    %56 = vector.extract_strided_slice %55 {offsets = [0, 0], sizes = [2, 32], strides = [1, 1]} : vector<2x128xf32> to vector<2x32xf32>
    %57 = arith.negf %56 : vector<2x32xf32>
    %58 = math.exp %57 : vector<2x32xf32>
    %cst_36 = arith.constant 1.000000e+00 : f32
    %59 = vector.broadcast %cst_36 : f32 to vector<2x32xf32>
    %60 = arith.addf %59, %58 : vector<2x32xf32>
    %61 = arith.divf %59, %60 : vector<2x32xf32>
    %62 = vector.extract_strided_slice %55 {offsets = [0, 32], sizes = [2, 32], strides = [1, 1]} : vector<2x128xf32> to vector<2x32xf32>
    %63 = arith.negf %62 : vector<2x32xf32>
    %64 = math.exp %63 : vector<2x32xf32>
    %cst_37 = arith.constant 1.000000e+00 : f32
    %65 = vector.broadcast %cst_37 : f32 to vector<2x32xf32>
    %66 = arith.addf %65, %64 : vector<2x32xf32>
    %67 = arith.divf %65, %66 : vector<2x32xf32>
    %68 = vector.extract_strided_slice %55 {offsets = [0, 64], sizes = [2, 32], strides = [1, 1]} : vector<2x128xf32> to vector<2x32xf32>
    %69 = math.tanh %68 : vector<2x32xf32>
    %70 = vector.extract_strided_slice %55 {offsets = [0, 96], sizes = [2, 32], strides = [1, 1]} : vector<2x128xf32> to vector<2x32xf32>
    %71 = arith.negf %70 : vector<2x32xf32>
    %72 = math.exp %71 : vector<2x32xf32>
    %cst_38 = arith.constant 1.000000e+00 : f32
    %73 = vector.broadcast %cst_38 : f32 to vector<2x32xf32>
    %74 = arith.addf %73, %72 : vector<2x32xf32>
    %75 = arith.divf %73, %74 : vector<2x32xf32>
    %76 = arith.mulf %67, %10 : vector<2x32xf32>
    %77 = arith.mulf %61, %69 : vector<2x32xf32>
    %78 = arith.addf %76, %77 : vector<2x32xf32>
    %79 = math.tanh %78 : vector<2x32xf32>
    %80 = arith.mulf %75, %79 : vector<2x32xf32>
    %c0_39 = arith.constant 0 : index
    %c0_40 = arith.constant 0 : index
    %c0_41 = arith.constant 0 : index
    %81 = vector.load %arg13[%c0_39, %c0_40, %c0_41] : memref<2x2x32xf32, #tpu.memory_space<vmem>>, vector<1x2x32xf32>
    %82 = vector.shape_cast %81 : vector<1x2x32xf32> to vector<2x32xf32>
    %83 = vector.shape_cast %46 : vector<2x32xf32> to vector<1x2x32xf32>
    tpu.vector_store %arg13[%c0_39, %c0_40, %c0_41], %83 {strides = array<i32>} : memref<2x2x32xf32, #tpu.memory_space<vmem>>, vector<1x2x32xf32>,
    %c1_42 = arith.constant 1 : index
    %c0_43 = arith.constant 0 : index
    %c0_44 = arith.constant 0 : index
    %84 = vector.load %arg13[%c1_42, %c0_43, %c0_44] : memref<2x2x32xf32, #tpu.memory_space<vmem>>, vector<1x2x32xf32>
    %85 = vector.shape_cast %84 : vector<1x2x32xf32> to vector<2x32xf32>
    %86 = vector.shape_cast %80 : vector<2x32xf32> to vector<1x2x32xf32>
    tpu.vector_store %arg13[%c1_42, %c0_43, %c0_44], %86 {strides = array<i32>} : memref<2x2x32xf32, #tpu.memory_space<vmem>>, vector<1x2x32xf32>,
    %c0_45 = arith.constant 0 : index
    %c0_46 = arith.constant 0 : index
    %c0_47 = arith.constant 0 : index
    %87 = vector.load %arg14[%c0_45, %c0_46, %c0_47] : memref<2x2x32xf32, #tpu.memory_space<vmem>>, vector<1x2x32xf32>
    %88 = vector.shape_cast %87 : vector<1x2x32xf32> to vector<2x32xf32>
    %89 = vector.shape_cast %44 : vector<2x32xf32> to vector<1x2x32xf32>
    tpu.vector_store %arg14[%c0_45, %c0_46, %c0_47], %89 {strides = array<i32>} : memref<2x2x32xf32, #tpu.memory_space<vmem>>, vector<1x2x32xf32>,
    %c1_48 = arith.constant 1 : index
    %c0_49 = arith.constant 0 : index
    %c0_50 = arith.constant 0 : index
    %90 = vector.load %arg14[%c1_48, %c0_49, %c0_50] : memref<2x2x32xf32, #tpu.memory_space<vmem>>, vector<1x2x32xf32>
    %91 = vector.shape_cast %90 : vector<1x2x32xf32> to vector<2x32xf32>
    %92 = vector.shape_cast %78 : vector<2x32xf32> to vector<1x2x32xf32>
    tpu.vector_store %arg14[%c1_48, %c0_49, %c0_50], %92 {strides = array<i32>} : memref<2x2x32xf32, #tpu.memory_space<vmem>>, vector<1x2x32xf32>,
    %93 = arith.truncf %80 : vector<2x32xf32> to vector<2x32xbf16>
    %c0_51 = arith.constant 0 : index
    %c0_52 = arith.constant 0 : index
    %94 = vector.load %arg9[%c0_51, %c0_52] : memref<32x8xbf16, #tpu.memory_space<vmem>>, vector<32x8xbf16>
    %cst_53 = arith.constant dense<0.000000e+00> : vector<2x8xf32>
    %95 = tpu.matmul %93, %94, %cst_53 {dimension_numbers = #tpu.dot_dimension_numbers<[1], [0], [0], [1], [0, 0, 1, 1], [], []>} : vector<2x32xbf16>, vector<32x8xbf16>, vector<2x8xf32> -> vector<2x8xf32>
    %c0_54 = arith.constant 0 : index
    %c0_55 = arith.constant 0 : index
    %96 = vector.load %arg10[%c0_54, %c0_55] : memref<1x8xf32, #tpu.memory_space<vmem>>, vector<1x8xf32>
    %97 = vector.broadcast %96 : vector<1x8xf32> to vector<2x8xf32>
    %98 = arith.addf %95, %97 : vector<2x8xf32>
    %cst_56 = arith.constant dense<0xFF800000> : vector<2xf32>
    %99 = vector.multi_reduction <maximumf>, %98, %cst_56 [1] : vector<2x8xf32> to vector<2xf32>
    %100 = vector.shape_cast %99 : vector<2xf32> to vector<2x1xf32>
    %101 = vector.broadcast %100 : vector<2x1xf32> to vector<2x8xf32>
    %102 = arith.subf %98, %101 : vector<2x8xf32>
    %103 = math.exp %102 : vector<2x8xf32>
    %cst_57 = arith.constant dense<0.000000e+00> : vector<2xf32>
    %104 = vector.multi_reduction <add>, %103, %cst_57 [1] : vector<2x8xf32> to vector<2xf32>
    %105 = vector.shape_cast %104 : vector<2xf32> to vector<2x1xf32>
    %106 = vector.broadcast %105 : vector<2x1xf32> to vector<2x8xf32>
    %107 = arith.divf %103, %106 : vector<2x8xf32>
    %108 = arith.index_cast %arg0 : i32 to index
    %c0_58 = arith.constant 0 : index
    %c0_59 = arith.constant 0 : index
    %109 = vector.load %arg11[%108, %c0_58, %c0_59] : memref<1x2x8xf32, #tpu.memory_space<vmem>>, vector<1x2x8xf32>
    %110 = vector.shape_cast %109 : vector<1x2x8xf32> to vector<2x8xf32>
    %111 = vector.shape_cast %107 : vector<2x8xf32> to vector<1x2x8xf32>
    tpu.vector_store %arg11[%108, %c0_58, %c0_59], %111 {strides = array<i32>} : memref<1x2x8xf32, #tpu.memory_space<vmem>>, vector<1x2x8xf32>,
    %112 = tpu.iota {dimensions = array<i32: 1>} : vector<2x8xi32>
    %113 = vector.broadcast %100 : vector<2x1xf32> to vector<2x8xf32>
    %114 = arith.cmpf oeq, %98, %113 : vector<2x8xf32>
    %c8_i32 = arith.constant 8 : i32
    %115 = vector.broadcast %c8_i32 : i32 to vector<2x8xi32>
    %116 = arith.select %114, %112, %115 : vector<2x8xi1>, vector<2x8xi32>
    %cst_60 = arith.constant dense<2147483647> : vector<2xi32>
    %117 = vector.multi_reduction <minsi>, %116, %cst_60 [1] : vector<2x8xi32> to vector<2xi32>
    %118 = vector.shape_cast %117 : vector<2xi32> to vector<2x1xi32>
    %119 = arith.index_cast %arg0 : i32 to index
    %c0_61 = arith.constant 0 : index
    %c0_62 = arith.constant 0 : index
    %120 = vector.load %arg12[%119, %c0_61, %c0_62] : memref<1x2x1xi32, #tpu.memory_space<vmem>>, vector<1x2x1xi32>
    %121 = vector.shape_cast %120 : vector<1x2x1xi32> to vector<2x1xi32>
    %122 = vector.shape_cast %118 : vector<2x1xi32> to vector<1x2x1xi32>
    tpu.vector_store %arg12[%119, %c0_61, %c0_62], %122 {strides = array<i32>} : memref<1x2x1xi32, #tpu.memory_space<vmem>>, vector<1x2x1xi32>,
    return
  }
  func.func @transform_0(%arg0: i32) -> (i32, i32, i32) {
    %c0_i32 = arith.constant 0 : i32
    %c0_i32_0 = arith.constant 0 : i32
    %c0_i32_1 = arith.constant 0 : i32
    return %arg0, %c0_i32, %c0_i32_0 : i32, i32, i32
  }
  func.func @transform_1(%arg0: i32) -> (i32, i32) {
    %c0_i32 = arith.constant 0 : i32
    %c0_i32_0 = arith.constant 0 : i32
    %c0_i32_1 = arith.constant 0 : i32
    return %c0_i32, %c0_i32_0 : i32, i32
  }
  func.func @transform_2(%arg0: i32) -> (i32, i32, i32) {
    %c0_i32 = arith.constant 0 : i32
    %c0_i32_0 = arith.constant 0 : i32
    %c0_i32_1 = arith.constant 0 : i32
    %c0_i32_2 = arith.constant 0 : i32
    return %c0_i32, %c0_i32_0, %c0_i32_1 : i32, i32, i32
  }
  func.func @transform_3(%arg0: i32) -> (i32, i32, i32) {
    %c0_i32 = arith.constant 0 : i32
    %c0_i32_0 = arith.constant 0 : i32
    %c0_i32_1 = arith.constant 0 : i32
    %c0_i32_2 = arith.constant 0 : i32
    return %c0_i32, %c0_i32_0, %c0_i32_1 : i32, i32, i32
  }
  func.func @transform_4(%arg0: i32) -> (i32, i32) {
    %c0_i32 = arith.constant 0 : i32
    %c0_i32_0 = arith.constant 0 : i32
    %c0_i32_1 = arith.constant 0 : i32
    return %c0_i32, %c0_i32_0 : i32, i32
  }
  func.func @transform_5(%arg0: i32) -> (i32, i32) {
    %c0_i32 = arith.constant 0 : i32
    %c0_i32_0 = arith.constant 0 : i32
    %c0_i32_1 = arith.constant 0 : i32
    return %c0_i32, %c0_i32_0 : i32, i32
  }
  func.func @transform_6(%arg0: i32) -> (i32, i32) {
    %c0_i32 = arith.constant 0 : i32
    %c0_i32_0 = arith.constant 0 : i32
    %c0_i32_1 = arith.constant 0 : i32
    return %c0_i32, %c0_i32_0 : i32, i32
  }
  func.func @transform_7(%arg0: i32) -> (i32, i32) {
    %c0_i32 = arith.constant 0 : i32
    %c0_i32_0 = arith.constant 0 : i32
    %c0_i32_1 = arith.constant 0 : i32
    return %c0_i32, %c0_i32_0 : i32, i32
  }
  func.func @transform_8(%arg0: i32) -> (i32, i32) {
    %c0_i32 = arith.constant 0 : i32
    %c0_i32_0 = arith.constant 0 : i32
    %c0_i32_1 = arith.constant 0 : i32
    return %c0_i32, %c0_i32_0 : i32, i32
  }
  func.func @transform_9(%arg0: i32) -> (i32, i32) {
    %c0_i32 = arith.constant 0 : i32
    %c0_i32_0 = arith.constant 0 : i32
    %c0_i32_1 = arith.constant 0 : i32
    return %c0_i32, %c0_i32_0 : i32, i32
  }
  func.func @transform_10(%arg0: i32) -> (i32, i32, i32) {
    %c0_i32 = arith.constant 0 : i32
    %c0_i32_0 = arith.constant 0 : i32
    %c0_i32_1 = arith.constant 0 : i32
    %c0_i32_2 = arith.constant 0 : i32
    return %c0_i32, %c0_i32_0, %c0_i32_1 : i32, i32, i32
  }
  func.func @transform_11(%arg0: i32) -> (i32, i32, i32) {
    %c0_i32 = arith.constant 0 : i32
    %c0_i32_0 = arith.constant 0 : i32
    %c0_i32_1 = arith.constant 0 : i32
    %c0_i32_2 = arith.constant 0 : i32
    return %c0_i32, %c0_i32_0, %c0_i32_1 : i32, i32, i32
  }
  func.func @transform_12(%arg0: i32) -> (i32, i32, i32) {
    %c0_i32 = arith.constant 0 : i32
    %c0_i32_0 = arith.constant 0 : i32
    %c0_i32_1 = arith.constant 0 : i32
    %c0_i32_2 = arith.constant 0 : i32
    return %c0_i32, %c0_i32_0, %c0_i32_1 : i32, i32, i32
  }
  func.func @transform_13(%arg0: i32) -> (i32, i32, i32) {
    %c0_i32 = arith.constant 0 : i32
    %c0_i32_0 = arith.constant 0 : i32
    %c0_i32_1 = arith.constant 0 : i32
    %c0_i32_2 = arith.constant 0 : i32
    return %c0_i32, %c0_i32_0, %c0_i32_1 : i32, i32, i32
  }
}

</mosaic_0001>

<bundles_post_ra>
// kernel: decoder_forward.1
= control target key start
LH: loop header
LB: loop body
LE: loop exit
PB: predicated region body
PF: predicated region fallthrough
CT: control target
= control target key end

     0   :  { %19 = vsyncpa [#allocation5], 0  ;;  %s1314_s0 = inlined_call_operand.vmem [shape: f32[1,2,4], index: 0, kind: input, shape index: {}]   ;;  %s1315_s1 = inlined_call_operand.vmem [shape: f32[2,8], index: 1, kind: input, shape index: {}]   ;;  %s1316_s2 = inlined_call_operand.vmem [shape: f32[2,2,32], index: 2, kind: input, shape index: {}, may-alias: {2,12}]   ;;  %s1317_s3 = inlined_call_operand.vmem [shape: f32[2,2,32], index: 3, kind: input, shape index: {}, may-alias: {3,13}]   ;;  %s1318_s4 = inlined_call_operand.hbm [shape: bf16[384,128], index: 4, kind: input, shape index: {}]   ;;  %s1319_s5 = inlined_call_operand.vmem [shape: f32[1,128], index: 5, kind: input, shape index: {}]   ;;  %s1320_s6 = inlined_call_operand.hbm [shape: bf16[256,128], index: 6, kind: input, shape index: {}]   ;;  %s1321_s7 = inlined_call_operand.vmem [shape: f32[1,128], index: 7, kind: input, shape index: {}]   ;;  %s1322_s8 = inlined_call_operand.vmem [shape: bf16[32,8], index: 8, kind: input, shape index: {}]   ;;  %s1323_s9 = inlined_call_operand.vmem [shape: f32[1,8], index: 9, kind: input, shape index: {}]   ;;  %s1324_s10 = inlined_call_operand.hbm [shape: f32[1,2,8], index: 10, kind: output, shape index: {0}]   ;;  %s1325_s11 = inlined_call_operand.vmem [shape: s32[1,2,1], index: 11, kind: output, shape index: {1}]   ;;  %s1326_s12 = inlined_call_operand.vmem [shape: f32[2,2,32], index: 12, kind: output, shape index: {2}, may-alias: {2,12}]   ;;  %s1327_s13 = inlined_call_operand.vmem [shape: f32[2,2,32], index: 13, kind: output, shape index: {3}, may-alias: {3,13}]  }
   0x1   :  { %20 = vsyncpa [#allocation8], 0 }
   0x2   :  { %21 = vsyncpa [#allocation6], 0  ;;  %s1090_s25 = smov [#allocation4]  }
   0x3   :  { %s35_s26 = sshll.u32 %s1090_s25, 4  ;;  %s36_s26 = int_to_ptr.vmem [resolvable:$true] %s35_s26 }
   0x4   :  { %s1032_s27 = scalar_lea.vmem %s36_s26, 3072  ;;  %p1037_p1 = scmp.lt.s32.totalorder %s36_s26, %s36_s26 }
   0x5   :  { %p1033_p0 = scmp.ne.s32.totalorder %s36_s26, %s1032_s27  ;;  %p1038_p2 = scmp.lt.s32.totalorder %s1032_s27, %s1032_s27 }
   0x7   :  { %p1039_p3 = por %p1038_p2, %p1037_p1 }
   0x9   :  { %p1040_p4 = pnand %p1039_p3, %p1033_p0 }
   0xb   :  { %1043 = shalt.err (!%p1040_p4)
}
   0xc   :  { %s1091_s28 = smov 64   ;;  %s1092_s29 = smov 4  }
   0xd   :  { %41 = dma.hbm_to_vmem [thread:$0]  %s1318_s4, 3072, %s36_s26, [#allocation5], %s1091_s28, %s1091_s28, %s1092_s29  }
   0xe   :  { %s1093_s15 = smov [#allocation7]  }
   0xf   :  { %s49_s16 = sshll.u32 %s1093_s15, 4  ;;  %s50_s16 = int_to_ptr.vmem [resolvable:$true] %s49_s16 }
  0x10   :  { %s1052_s17 = scalar_lea.vmem %s50_s16, 2048  ;;  %p1057_p6 = scmp.lt.s32.totalorder %s50_s16, %s50_s16 }
  0x11   :  { %p1053_p5 = scmp.ne.s32.totalorder %s50_s16, %s1052_s17  ;;  %p1058_p7 = scmp.lt.s32.totalorder %s1052_s17, %s1052_s17 }
  0x13   :  { %p1059_p8 = por %p1058_p7, %p1057_p6 }
  0x15   :  { %p1060_p9 = pnand %p1059_p8, %p1053_p5 }
  0x17   :  { %1063 = shalt.err (!%p1060_p9)
}
  0x18   :  { %55 = dma.hbm_to_vmem [thread:$0]  %s1320_s6, 2048, %s50_s16, [#allocation8], %s1091_s28, %s1091_s28, %s1092_s29  }
  0x19   :  { %1084 = dma.done.wait [#allocation5], 3072  }
  0x1a   :  { %1085 = vsyncadd [#allocation5], 4294964224 }
  0x1b   :  { %1086 = dma.done.wait [#allocation8], 2048  }
  0x1c   :  { %1087 = vsyncadd [#allocation8], 4294965248  ;;  %v1094_v0 = vmov 0.0   ;;  %vm1095_vm0 = vmmov 0   ;;  %v961_v1 = vld [vmem:[#allocation4 + $0x78] sm:$0xff]   ;;  %v964_v4 = vld [vmem:[#allocation4 + $0x70] sm:$0xff]   ;;  %v104_v19 = vlaneseq }
  0x1d   :  { %923 = vmatprep.subr.bf16.mxu1 %v1094_v0  ;;  %82 = vst [vmem:[#allocation2] sm:$0x3f] %v1094_v0  ;;  %83 = vst [vmem:[#allocation3] sm:$0xf] %v1094_v0  ;;  %939 = vmatprep.mubr.msk.bf16.mxu1 %vm1095_vm0, %v1094_v0  ;;  %v962_v2 = vld [vmem:[#allocation4 + $0x38] sm:$0xff]   ;;  %v965_v5 = vld [vmem:[#allocation4 + $0x30] sm:$0xff]  }
  0x1e   :  { %867 = vmatprep.subr.bf16.mxu0 %v961_v1  ;;  %v963_v3 = vld [vmem:[#allocation4 + $0xb8] sm:$0xff]   ;;  %v966_v6 = vld [vmem:[#allocation4 + $0xb0] sm:$0xff]   ;;  %v967_v7 = vld [vmem:[#allocation4 + $0x68] sm:$0xff]   ;;  %vm75_vm1 = vcmask 254976   ;;  %vm85_vm2 = vcmask 58368   ;;  %vm94_vm3 = vcmask 25600  }
  0x1f   :  { %868 = vmatpush3.bf16.msra.mxu0 %v962_v2  ;;  %924 = vmatpush3.bf16.msra.mxu1 %v963_v3  ;;  %v968_v8 = vld [vmem:[#allocation4 + $0x28] sm:$0xff]   ;;  %v970_v10 = vld [vmem:[#allocation4 + $0x60] sm:$0xff]   ;;  %v973_v13 = vld [vmem:[#allocation4 + $0x58] sm:$0xff]   ;;  %v105_v24 = vshrl.u32 %v104_v19, 7  ;;  %v1096_v30 = vmov 1983009808  }
  0x20   :  { %869 = vmatprep.subr.bf16.mxu0 %v964_v4  ;;  %925 = vmatprep.subr.bf16.mxu1 %v1094_v0  ;;  %v969_v9 = vld [vmem:[#allocation4 + $0xa8] sm:$0xff]   ;;  %v971_v11 = vld [vmem:[#allocation4 + $0x20] sm:$0xff]   ;;  %v974_v14 = vld [vmem:[#allocation4 + $0x18] sm:$0xff]   ;;  %v102_v31 = vunpack.c.l.s4 %v1096_v30  ;;  %s1097_s18 = smov 32   ;;  %vm705_vm4 = vcmask 261120   ;;  %s1099_s19 = smov [#allocation9]  }
  0x21   :  { %v972_v12 = vld [vmem:[#allocation4 + $0xa0] sm:$0xff]   ;;  %v975_v15 = vld [vmem:[#allocation4 + $0x98] sm:$0xff]   ;;  %v976_v16 = vld [vmem:[#allocation4 + $0x50] sm:$0xff]   ;;  %s792_s4 = sshll.u32 %s1099_s19, 4  ;;  %s793_s4 = int_to_ptr.vmem [resolvable:$true] %s792_s4 }
  0x22   :  { %v977_v17 = vld [vmem:[#allocation4 + $0x10] sm:$0xff]   ;;  %v979_v20 = vld [vmem:[#allocation4 + $0x48] sm:$0xff]   ;;  %v982_v23 = vld [vmem:[#allocation4 + $0x40] sm:$0xff]   ;;  %v103_v33 = vunpack.c.0.s8 %v102_v31  ;;  %s1064_s6 = scalar_lea.vmem %s793_s4, 32  ;;  %p1069_p11 = scmp.lt.s32.totalorder %s793_s4, %s793_s4 }
  0x23   :  { %870 = vmatpush3.bf16.msra.mxu0 %v965_v5  ;;  %926 = vmatpush3.bf16.msra.mxu1 %v966_v6  ;;  %v978_v18 = vld [vmem:[#allocation4 + $0x90] sm:$0xff]   ;;  %v980_v21 = vld [vmem:[#allocation4 + $0x8] sm:$0xff]   ;;  %v983_v28 = vld [vmem:[#allocation4] sm:$0xff]   ;;  %p1065_p10 = scmp.ne.s32.totalorder %s793_s4, %s1064_s6  ;;  %p1070_p12 = scmp.lt.s32.totalorder %s1064_s6, %s1064_s6 }
  0x24   :  { %871 = vmatprep.subr.bf16.mxu0 %v967_v7  ;;  %927 = vmatprep.subr.bf16.mxu1 %v1094_v0  ;;  %v981_v22 = vld [vmem:[#allocation4 + $0x88] sm:$0xff]   ;;  %v73_v25 = vld [vmem:[%s1316_s2] sm:$0x3]  ;;  %v984_v29 = vld [vmem:[#allocation4 + $0x80] sm:$0xff]   ;;  %v1212_v34 = vsub.s32 %v103_v33, %v105_v24 }
  0x25   :  { %v84_v26 = vld [vmem:[%s1315_s1] sm:$0x3]  ;;  %76 = vst.msk [vmem:[%s1326_s12] sm:$0x3] %vm75_vm1, %v73_v25  ;;  %v986_v5 = vld [vmem:[#allocation7 + $0x78] sm:$0xff]   ;;  %v1001_v24 = vld [vmem:[#allocation7] sm:$0xff]   ;;  %p1071_p13 = por %p1070_p12, %p1069_p11 }
  0x26   :  { %v93_v27 = vld [vmem:[%s1314_s0] sm:$0x3]  ;;  %86 = vst.msk [vmem:[#allocation2 + $0x2] sm:$0x3] %vm85_vm2, %v84_v26  ;;  %v987_v6 = vld [vmem:[#allocation7 + $0x38] sm:$0xff]  }
  0x27   :  { %872 = vmatpush3.bf16.msra.mxu0 %v968_v8  ;;  %928 = vmatpush3.bf16.msra.mxu1 %v969_v9  ;;  %95 = vst.msk [vmem:[#allocation2] sm:$0x3] %vm94_vm3, %v93_v27  ;;  %v78_v43 = vld [vmem:[%s1317_s3] sm:$0x3]  ;;  %p1072_p0 = pnand %p1071_p13, %p1065_p10 }
  0x28   :  { %873 = vmatprep.subr.bf16.mxu0 %v970_v10  ;;  %929 = vmatprep.subr.bf16.mxu1 %v1094_v0  ;;  %80 = vst.msk [vmem:[%s1327_s13] sm:$0x3] %vm75_vm1, %v78_v43  ;;  %v816_v47 = vld [vmem:[%s1319_s5] ss:$0 sm:$0xff]  ;;  %v990_v10 = vld [vmem:[#allocation7 + $0x68] sm:$0xff]  }
  0x29   :  { %v988_v7 = vld [vmem:[#allocation7 + $0x70] sm:$0xff]  }
  0x2a   :  { %v989_v8 = vld [vmem:[#allocation7 + $0x30] sm:$0xff]  }
  0x2b   :  { %874 = vmatpush3.bf16.msra.mxu0 %v971_v11  ;;  %930 = vmatpush3.bf16.msra.mxu1 %v972_v12  ;;  %v991_v11 = vld [vmem:[#allocation7 + $0x28] sm:$0xff]  }
  0x2c   :  { %875 = vmatprep.subr.bf16.mxu0 %v973_v13  ;;  %931 = vmatprep.subr.bf16.mxu1 %v1094_v0  ;;  %v87_v32 = vld [vmem:[%s1326_s12] sm:$0x3]  ;;  %v74_v9 = vld [vmem:[%s1316_s2 + $0x2] sm:$0x3]  ;;  %v992_v13 = vld [vmem:[#allocation7 + $0x60] sm:$0xff]  }
  0x2d   :  { %97 = vst.msk [vmem:[#allocation2 + $0x4] sm:$0x3] %vm75_vm1, %v87_v32  ;;  %77 = vst.msk [vmem:[%s1326_s12 + $0x2] sm:$0x3] %vm75_vm1, %v74_v9 }
  0x2f   :  { %876 = vmatpush3.bf16.msra.mxu0 %v974_v14  ;;  %932 = vmatpush3.bf16.msra.mxu1 %v975_v15  ;;  %v90_v57 = vld [vmem:[%s1327_s13] sm:$0x3]  ;;  %v993_v14 = vld [vmem:[#allocation7 + $0x20] sm:$0xff]  }
  0x30   :  { %877 = vmatprep.subr.bf16.mxu0 %v976_v16  ;;  %933 = vmatprep.subr.bf16.mxu1 %v1094_v0  ;;  %v994_v16 = vld [vmem:[#allocation7 + $0x58] sm:$0xff]  }
  0x33   :  { %878 = vmatpush3.bf16.msra.mxu0 %v977_v17  ;;  %934 = vmatpush3.bf16.msra.mxu1 %v978_v18  ;;  %v995_v17 = vld [vmem:[#allocation7 + $0x18] sm:$0xff]   ;;  %v996_v18 = vld [vmem:[#allocation7 + $0x50] sm:$0xff]  }
  0x34   :  { %879 = vmatprep.subr.bf16.mxu0 %v979_v20  ;;  %935 = vmatprep.subr.bf16.mxu1 %v1094_v0  ;;  %v98_v35 = vld [vmem:[#allocation2] sm:$0x3f] }
  0x35   :  { %v100_v36 = vcombine.high %v98_v35, %v98_v35  ;;  %v107_v37 = vrot.slane %v98_v35, %v1212_v34  ;;  %v814_v15 = vld [vmem:[%s1326_s12 + $0x2] sm:$0x3]  ;;  %v997_v20 = vld [vmem:[#allocation7 + $0x10] sm:$0xff]  }
  0x36   :  { %441 = vst.msk [vmem:[#allocation3 + $0x2] sm:$0x3] %vm75_vm1, %v814_v15 }
  0x37   :  { %880 = vmatpush3.bf16.msra.mxu0 %v980_v21  ;;  %936 = vmatpush3.bf16.msra.mxu1 %v981_v22  ;;  %v115_v38 = vcombine.high %v107_v37, %v107_v37  ;;  %v114_v39 = vrot.slane %v100_v36, %v1212_v34  ;;  %v119_v40 = vpack.c.bf16 %v107_v37, %v107_v37  ;;  %v998_v21 = vld [vmem:[#allocation7 + $0x48] sm:$0xff]   ;;  %v843_v36 = vld [vmem:[%s1321_s7] ss:$0 sm:$0xff] }
  0x38   :  { %881 = vmatprep.subr.bf16.mxu0 %v982_v23  ;;  %937 = vmatprep.subr.bf16.mxu1 %v1094_v0  ;;  %v999_v22 = vld [vmem:[#allocation7 + $0x8] sm:$0xff]   ;;  %v1000_v23 = vld [vmem:[#allocation7 + $0x40] sm:$0xff]  }
  0x39   :  { %v120_v41 = vpack.c.bf16 %v115_v38, %v115_v38  ;;  %v121_v42 = vpack.c.bf16 %v114_v39, %v114_v39 }
  0x3b   :  { %882 = vmatpush3.bf16.msra.mxu0 %v983_v28  ;;  %938 = vmatpush3.bf16.msra.mxu1 %v984_v29  ;;  %v79_v28 = vld [vmem:[%s1317_s3 + $0x2] sm:$0x3] }
  0x3c   :  { %943 = vmatprep.subr.bf16.mxu1 %v1094_v0  ;;  %353 = vmatprep.mubr.bf16.mxu0 %v120_v41  ;;  %81 = vst.msk [vmem:[%s1327_s13 + $0x2] sm:$0x3] %vm75_vm1, %v79_v28 }
  0x3d   :  { %898 = vmatprep.subr.bf16.mxu0 %v986_v5 }
  0x3e   :  { %940 = vmatmul.mubr.bf16.vlgmr.msra.gmra.mxu1 %v121_v42  ;;  %354 = vmatmul.mubr.bf16.vlgmr.msra.gmra.mxu0 %v119_v40 }
  0x3f   :  { %947 = vmatprep.mubr.msk.bf16.mxu1 %vm1095_vm0, %v1094_v0  ;;  %899 = vmatpush3.bf16.msra.mxu0 %v987_v6 }
  0x40   :  { %900 = vmatprep.subr.bf16.mxu0 %v988_v7 }
  0x43   :  { %901 = vmatpush3.bf16.msra.mxu0 %v989_v8  ;;  %v815_v29 = vld [vmem:[%s1327_s13 + $0x2] sm:$0x3] }
  0x44   :  { %902 = vmatprep.subr.bf16.mxu0 %v990_v10 }
  0x47   :  { %903 = vmatpush3.bf16.msra.mxu0 %v991_v11 }
  0x48   :  { %904 = vmatprep.subr.bf16.mxu0 %v992_v13 }
  0x4b   :  { %905 = vmatpush3.bf16.msra.mxu0 %v993_v14 }
  0x4c   :  { %906 = vmatprep.subr.bf16.mxu0 %v994_v16 }
  0x4f   :  { %907 = vmatpush3.bf16.msra.mxu0 %v995_v17 }
  0x50   :  { %908 = vmatprep.subr.bf16.mxu0 %v996_v18 }
  0x53   :  { %909 = vmatpush3.bf16.msra.mxu0 %v997_v20 }
  0x54   :  { %910 = vmatprep.subr.bf16.mxu0 %v998_v21 }
  0x57   :  { %911 = vmatpush3.bf16.msra.mxu0 %v999_v22 }
  0x58   :  { %912 = vmatprep.subr.bf16.mxu0 %v1000_v23 }
  0x5b   :  { %913 = vmatpush3.bf16.msra.mxu0 %v1001_v24 }
  0xfe   :  { %v395_v44 = vpop.f32.mrf.mxu1  ;;  %v883_v45 = vpop.f32.mrf.mxu0 }
 0x100   :  { %v941_v46 = vpop.f32.mrf.mxu1  ;;  %v884_v48 = vpop.f32.mrf.mxu0 }
 0x101   :  { %v885_v49 = vadd.f32 %v884_v48, %v883_v45 }
 0x102   :  { %v398_v50 = vpop.f32.mrf.mxu1  ;;  %v886_v51 = vpop.f32.mrf.mxu0 }
 0x103   :  { %v356_v52 = vadd.f32 %v885_v49, %v816_v47 }
 0x104   :  { %v942_v53 = vpop.f32.mrf.mxu1  ;;  %v887_v54 = vpop.f32.mrf.mxu0 }
 0x105   :  { %v396_v55 = vadd.f32 %v395_v44, %v356_v52  ;;  %v1002_v53 = vld [vmem:[%s1322_s8 + $0x8] sm:$0xff]   ;;  %v1003_v54 = vld [vmem:[%s1322_s8] sm:$0xff]   ;;  %s1098_s8 = smov 96  }
 0x106   :  { %944 = vmatpush3.bf16.msra.mxu1 %v1002_v53 }
 0x107   :  { %1004 = vtanh.f32 %v396_v55  ;;  %v841_v58 = vmul.f32 -1.442695, %v396_v55  ;;  %945 = vmatprep.subr.bf16.mxu1 %v1094_v0 }
 0x109   :  { %1006 = vpow2.f32 %v841_v58 }
 0x10a   :  { %946 = vmatpush3.bf16.msra.mxu1 %v1003_v54 }
 0x114   :  { %v1005_v56 = vpop.eup %1004 }
 0x115   :  { %414 = vrot.lane.b32.xlu0 %v1005_v56, %s1091_s28 }
 0x116   :  { %v1007_v59 = vpop.eup %1006 }
 0x117   :  { %v404_v60 = vadd.f32 1.0, %v1007_v59 }
 0x119   :  { %409 = vrot.lane.b32.xlu0 %v90_v57, %s1097_s18  ;;  %1008 = vrcp.f32 %v404_v60  ;;  %v863_v60 = vld [vmem:[%s1323_s9] ss:$0 sm:$0xff] }
 0x126   :  { %v1009_v61 = vpop.eup %1008 }
 0x187   :  { %v415_v62 = vpop.permute.xlu0 %414 }
 0x188   :  { %v417_v63 = vmul.f32 %v1009_v61, %v415_v62 }
 0x18a   :  { %419 = vrot.lane.b32.xlu1 %v417_v63, %s1097_s18 }
 0x18b   :  { %v410_v1 = vpop.permute.xlu0 %409 }
 0x18c   :  { %v412_v2 = vmul.f32 %v1009_v61, %v410_v1 }
 0x1fc   :  { %v420_v3 = vpop.permute.xlu1 %419 }
 0x1fd   :  { %v1234_v4 = vadd.f32 %v420_v3, %v412_v2  ;;  %v765_v3 = vand.u32 127, %v104_v19 }
 0x1ff   :  { %1010 = vtanh.f32 %v1234_v4 }
 0x20c   :  { %v1011_v12 = vpop.eup %1010 }
 0x20d   :  { %425 = vrot.lane.b32.xlu1 %v1011_v12, %s1091_s28 }
 0x27f   :  { %v426_v25 = vpop.permute.xlu1 %425 }
 0x280   :  { %v1249_v26 = vmul.f32 %v1009_v61, %v426_v25 }
 0x282   :  { %v436_v27 = vrot.slane %v1249_v26, %v1212_v34 }
 0x284   :  { %437 = vrot.lane.b32.xlu0 %v436_v27, %s1097_s18 }
 0x288   :  { %639 = vrot.lane.b32.xlu0 %v815_v29, %s1097_s18 }
 0x2f6   :  { %v438_v30 = vpop.permute.xlu0 %437 }
 0x2f7   :  { %440 = vst.msk [vmem:[#allocation3] sm:$0x3] %vm75_vm1, %v438_v30 }
 0x2fa   :  { %v640_v49 = vpop.permute.xlu0 %639 }
 0x2fe   :  { %v842_v31 = vld.sshfl [vmem:[#allocation3] sm:$0x33 pattern:$0x76325410] }
 0x2ff   :  { %v451_v32 = vcombine.high %v842_v31, %v842_v31  ;;  %v454_v34 = vpack.c.bf16 %v842_v31, %v842_v31 }
 0x301   :  { %v455_v33 = vpack.c.bf16 %v451_v32, %v451_v32 }
 0x303   :  { %623 = vmatprep.mubr.bf16.mxu0 %v455_v33 }
 0x304   :  { %624 = vmatmul.mubr.bf16.vlgmr.msra.gmra.mxu0 %v454_v34 }
 0x3c4   :  { %v914_v35 = vpop.f32.mrf.mxu0 }
 0x3c6   :  { %v915_v37 = vpop.f32.mrf.mxu0 }
 0x3c7   :  { %v916_v38 = vadd.f32 %v915_v37, %v914_v35 }
 0x3c8   :  { %v917_v39 = vpop.f32.mrf.mxu0 }
 0x3c9   :  { %v626_v40 = vadd.f32 %v916_v38, %v843_v36 }
 0x3ca   :  { %v918_v41 = vpop.f32.mrf.mxu0 }
 0x3cb   :  { %1012 = vtanh.f32 %v626_v40  ;;  %v860_v43 = vmul.f32 -1.442695, %v626_v40 }
 0x3cd   :  { %1014 = vpow2.f32 %v860_v43 }
 0x3d8   :  { %v1013_v42 = vpop.eup %1012 }
 0x3d9   :  { %644 = vrot.lane.b32.xlu1 %v1013_v42, %s1091_s28 }
 0x3da   :  { %v1015_v44 = vpop.eup %1014 }
 0x3db   :  { %v634_v45 = vadd.f32 1.0, %v1015_v44 }
 0x3dd   :  { %1016 = vrcp.f32 %v634_v45 }
 0x3ea   :  { %v1017_v46 = vpop.eup %1016 }
 0x3eb   :  { %v642_v50 = vmul.f32 %v1017_v46, %v640_v49 }
 0x44b   :  { %v645_v47 = vpop.permute.xlu1 %644 }
 0x44c   :  { %v647_v48 = vmul.f32 %v1017_v46, %v645_v47 }
 0x44e   :  { %649 = vrot.lane.b32.xlu1 %v647_v48, %s1097_s18 }
 0x4c0   :  { %v650_v51 = vpop.permute.xlu1 %649 }
 0x4c1   :  { %v652_v52 = vadd.f32 %v650_v51, %v642_v50 }
 0x4c3   :  { %1018 = vtanh.f32 %v652_v52 }
 0x4d0   :  { %v1019_v55 = vpop.eup %1018 }
 0x4d1   :  { %655 = vrot.lane.b32.xlu0 %v1019_v55, %s1091_s28 }
 0x543   :  { %v656_v56 = vpop.permute.xlu0 %655 }
 0x544   :  { %v658_v57 = vmul.f32 %v1017_v46, %v656_v56 }
 0x546   :  { %v678_v58 = vpack.c.bf16 %v658_v57, %v658_v57 }
 0x548   :  { %691 = vrot.lane.b32.xlu1 %v678_v58, %s1097_s18 }
 0x5ba   :  { %v692_v59 = vpop.permute.xlu1 %691 }
 0x5bb   :  { %948 = vmatmul.mubr.msk.bf16.vlgmr.msra.gmra.mxu1 %vm705_vm4, %v692_v59 }
 0x67b   :  { %v743_v61 = vpop.f32.mrf.mxu1 }
 0x67c   :  { %v744_v62 = vadd.f32 %v863_v60, %v743_v61 }
 0x67d   :  { %v949_v63 = vpop.f32.mrf.mxu1 }
 0x67e   :  { %v750_v0 = vsel %vm85_vm2, %v744_v62, -inf }
 0x67f   :  { %751 = vmax.xlane.f32.xlu0 %v750_v0  ;;  %v746_v1 = vpop.f32.mrf.mxu1 }
 0x681   :  { %v950_v2 = vpop.f32.mrf.mxu1 }
 0x708   :  { %v752_v5 = vpop.xlane.xlu0 %751 }
 0x709   :  { %v753_v6 = vsub.f32 %v744_v62, %v752_v5  ;;  %vm766_vm5 = vcmp.eq.f32.partialorder %v744_v62, %v752_v5 }
 0x70a   :  { %v767_v7 = vsel %vm766_vm5, %v765_v3, 8 }
 0x70b   :  { %v754_v8 = vmul.f32 1.442695, %v753_v6  ;;  %v768_v9 = vsel %vm85_vm2, %v767_v7, 2147483647 }
 0x70c   :  { %v770_v10 = vshra.s32 %v768_v9, 16  ;;  %v769_v19 = vand.u32 65535, %v768_v9 }
 0x70d   :  { %1020 = vpow2.f32 %v754_v8 }
 0x70e   :  { %v772_v11 = vcvt.s32.f32 %v770_v10  ;;  %v771_v15 = vcvt.s32.f32 %v769_v19 }
 0x710   :  { %773 = vmin.xlane.f32.xlu1 %v772_v11 }
 0x71a   :  { %v1021_v12 = vpop.eup %1020 }
 0x71b   :  { %v756_v13 = vsel %vm85_vm2, %v1021_v12, 0.0 }
 0x71c   :  { %757 = vadd.xlane.f32.xlu0 %v756_v13 }
 0x721   :  { %659 = vrot.lane.b32.xlu1 %v1249_v26, %s1097_s18 }
 0x725   :  { %669 = vrot.lane.b32.xlu1 %v1234_v4, %s1098_s8 }
 0x729   :  { %674 = vrot.lane.b32.xlu1 %v652_v52, %s1098_s8 }
 0x799   :  { %v774_v14 = vpop.xlane.xlu1 %773 }
 0x79a   :  { %vm775_vm6 = vcmp.eq.f32.partialorder %v772_v11, %v774_v14 }
 0x79b   :  { %v776_v16 = vsel %vm775_vm6, %v771_v15, inf }
 0x79c   :  { %777 = vmin.xlane.f32.xlu0 %v776_v16 }
 0x79d   :  { %v660_v17 = vpop.permute.xlu1 %659 }
 0x79e   :  { %662 = vst.msk [vmem:[%s1326_s12] sm:$0x3] %vm75_vm1, %v660_v17 }
 0x7a1   :  { %v670_v18 = vpop.permute.xlu1 %669 }
 0x7a2   :  { %672 = vst.msk [vmem:[%s1327_s13] sm:$0x3] %vm75_vm1, %v670_v18 }
 0x7a5   :  { %v675_v4 = vpop.permute.xlu1 %674  ;;  %v758_v20 = vpop.xlane.xlu0 %757 }
 0x7a6   :  { %862 = vst.msk [vmem:[%s1327_s13 + $0x2] sm:$0x3] %vm75_vm1, %v675_v4  ;;  %1022 = vrcp.f32 %v758_v20 }
 0x7b2   :  { %664 = vrot.lane.b32.xlu0 %v658_v57, %s1097_s18 }
 0x7b3   :  { %v1023_v21 = vpop.eup %1022 }
 0x7b4   :  { %v760_v22 = vmul.f32 %v1023_v21, %v1021_v12 }
 0x7b6   :  { %763 = vst.msk [vmem:[#allocation9] sm:$0x3] %vm85_vm2, %v760_v22 }
 0x7b7   :  { %1075 = shalt.err (!%p1072_p0)
}
 0x7b8   :  { %795 = dma.vmem_to_hbm [thread:$0]  %s793_s4, 32, %s1324_s10, [#allocation6]   ;;  %v780_v23 = vcvt.f32.s32 %v774_v14  ;;  %vm784_vm7 = vcmask 1024  }
 0x7ba   :  { %v781_v25 = vshll.u32 %v780_v23, 16 }
 0x825   :  { %v778_v24 = vpop.xlane.xlu0 %777 }
 0x826   :  { %v779_v26 = vcvt.f32.s32 %v778_v24 }
 0x828   :  { %v782_v27 = vadd.s32 %v781_v25, %v779_v26 }
 0x829   :  { %v665_v28 = vpop.permute.xlu0 %664 }
 0x82a   :  { %785 = vst.msk [vmem:[%s1325_s11] sm:$0x3] %vm784_vm7, %v782_v27 }
 0x82b   :  { %861 = vst.msk [vmem:[%s1326_s12 + $0x2] sm:$0x3] %vm75_vm1, %v665_v28 }
 0x82c   :  { %1088 = dma.done.wait [#allocation6], 32  }
 0x82d   :  { %1089 = vsyncadd [#allocation6], 4294967264 }
 0x82e   :  { %811 = vsyncpa [#allocation5], 1 }
 0x82f   :  { %812 = vsyncpa [#allocation8], 1 }
 0x830   :  { %813 = vsyncpa [#allocation6], 1 }

</bundles_post_ra>
